<compile_context>
chip_gen: v7x
topology: tpu7x:2x2x1
jax: 0.10.0
libtpu: 0.0.40
codegen_flags: <defaults>
</compile_context>

<pallas_src>
import functools

import jax
import jax.numpy as jnp
from jax.experimental import pallas as pl
from jax.experimental.pallas import tpu as pltpu

HIDDEN = 256
LN_EPS = 1e-5      # PyTorch nn.LayerNorm default
LANE = 128         # TPU lane width
SUBLANE = 8        # f32 sublane tile


def _round_up(x, m):
    return (x + m - 1) // m * m


def _layernorm(h, gamma, beta):
    # One-pass variance; gamma folded into the rsqrt scale (EUP handles rsqrt).
    mu = jnp.mean(h, axis=-1, keepdims=True)
    var = jnp.mean(h * h, axis=-1, keepdims=True) - mu * mu
    scale = gamma * jax.lax.rsqrt(var + LN_EPS)
    return (h - mu) * scale + beta


def dqn_kernel(x_ref,
               w1_ref, b1_ref, g1_ref, be1_ref,
               w2_ref, b2_ref, g2_ref, be2_ref,
               w3_ref, b3_ref,
               w4_ref, b4_ref,
               out_ref):
    # Activations flow in f32; MXU operands are cast to bf16 (weights stored bf16).
    x = x_ref[...]

    # conv[0..2]: Linear -> ReLU -> LayerNorm
    h = jnp.dot(x.astype(jnp.bfloat16), w1_ref[...],
                preferred_element_type=jnp.float32) + b1_ref[...]
    h = jnp.maximum(h, 0.0)
    h = _layernorm(h, g1_ref[...], be1_ref[...])

    # conv[3..5]: Linear -> ReLU -> LayerNorm
    h = jnp.dot(h.astype(jnp.bfloat16), w2_ref[...],
                preferred_element_type=jnp.float32) + b2_ref[...]
    h = jnp.maximum(h, 0.0)
    h = _layernorm(h, g2_ref[...], be2_ref[...])

    # fc[0..1]: Linear -> ReLU
    h = jnp.dot(h.astype(jnp.bfloat16), w3_ref[...],
                preferred_element_type=jnp.float32) + b3_ref[...]
    h = jnp.maximum(h, 0.0)

    # fc[2]: Linear -> Q values (lane-padded to a multiple of 128 columns)
    q = jnp.dot(h.astype(jnp.bfloat16), w4_ref[...],
                preferred_element_type=jnp.float32) + b4_ref[...]
    out_ref[...] = q.astype(out_ref.dtype)


@functools.partial(jax.jit, static_argnames=("tb",))
def dqn_forward(state, params, tb=512):
    """Runs the fused DQN MLP. `tb` is the batch tile (512 fits all VMEM sizes).

    Keep `params` resident on device between RL steps so the (bf16) weights are
    not re-uploaded every call; within one call they are DMA'd into VMEM exactly
    once and reused across all batch tiles.
    """
    (w1, b1, g1, be1, w2, b2, g2, be2, w3, b3, w4, b4) = params
    B, state_dim = state.shape
    n_actions = w4.shape[1]

    # Batch tile: at most `tb`, at least the batch rounded up to a sublane multiple.
    TB = min(tb, _round_up(B, SUBLANE))
    B_pad = _round_up(B, TB)
    if B_pad != B:
        state = jnp.pad(state, ((0, B_pad - B), (0, 0)))

    # Lane-dense output: pad the final layer to a multiple of 128 output columns
    # so the kernel's output store is an unmasked full-lane vst.
    N_pad = _round_up(n_actions, LANE)
    if N_pad != n_actions:
        w4 = jnp.pad(w4, ((0, 0), (0, N_pad - n_actions)))
        b4 = jnp.pad(b4, ((0, 0), (0, N_pad - n_actions)))

    row = lambda i: (i, 0)     # activations / outputs: tiled along batch
    const = lambda i: (0, 0)   # weights / biases / LN params: VMEM-resident

    q_pad = pl.pallas_call(
        dqn_kernel,
        out_shape=jax.ShapeDtypeStruct((B_pad, N_pad), jnp.float32),
        grid=(B_pad // TB,),
        in_specs=[
            pl.BlockSpec((TB, state_dim), row),
            pl.BlockSpec((state_dim, HIDDEN), const),
            pl.BlockSpec((1, HIDDEN), const),
            pl.BlockSpec((1, HIDDEN), const),
            pl.BlockSpec((1, HIDDEN), const),
            pl.BlockSpec((HIDDEN, HIDDEN), const),
            pl.BlockSpec((1, HIDDEN), const),
            pl.BlockSpec((1, HIDDEN), const),
            pl.BlockSpec((1, HIDDEN), const),
            pl.BlockSpec((HIDDEN, HIDDEN), const),
            pl.BlockSpec((1, HIDDEN), const),
            pl.BlockSpec((HIDDEN, N_pad), const),
            pl.BlockSpec((1, N_pad), const),
        ],
        out_specs=pl.BlockSpec((TB, N_pad), row),
        compiler_params=pltpu.CompilerParams(
            dimension_semantics=("parallel",),   # megacore sharding on v7x
        ),
    )(state, w1, b1, g1, be1, w2, b2, g2, be2, w3, b3, w4, b4)

    return q_pad[:B, :n_actions]


def init_params(key, state_dim, n_actions):
    """Deterministic init mimicking PyTorch's Linear default (U[-1/sqrt(fan_in), +]).

    Weights are stored in bf16 (MXU operands); biases / LN params stay f32.
    """
    def linear(key, fan_in, fan_out):
        kw, kb = jax.random.split(key)
        bound = 1.0 / jnp.sqrt(float(fan_in))
        w = jax.random.uniform(kw, (fan_in, fan_out), jnp.float32, -bound, bound)
        b = jax.random.uniform(kb, (1, fan_out), jnp.float32, -bound, bound)
        return w.astype(jnp.bfloat16), b

    k1, k2, k3, k4 = jax.random.split(key, 4)
    w1, b1 = linear(k1, state_dim, HIDDEN)
    w2, b2 = linear(k2, HIDDEN, HIDDEN)
    w3, b3 = linear(k3, HIDDEN, HIDDEN)
    w4, b4 = linear(k4, HIDDEN, n_actions)
    g1 = jnp.ones((1, HIDDEN), jnp.float32)
    be1 = jnp.zeros((1, HIDDEN), jnp.float32)
    g2 = jnp.ones((1, HIDDEN), jnp.float32)
    be2 = jnp.zeros((1, HIDDEN), jnp.float32)
    return (w1, b1, g1, be1, w2, b2, g2, be2, w3, b3, w4, b4)


def dqn_reference(state, params):
    """Pure-JAX reference (same bf16 matmul operands, canonical two-pass LN)."""
    (w1, b1, g1, be1, w2, b2, g2, be2, w3, b3, w4, b4) = params

    def lin(h, w, b):
        return jnp.dot(h.astype(jnp.bfloat16), w,
                       preferred_element_type=jnp.float32) + b

    def ln(h, gamma, beta):
        mu = jnp.mean(h, axis=-1, keepdims=True)
        var = jnp.mean((h - mu) * (h - mu), axis=-1, keepdims=True)
        return (h - mu) * jax.lax.rsqrt(var + LN_EPS) * gamma + beta

    h = jnp.maximum(lin(state, w1, b1), 0.0)
    h = ln(h, g1, be1)
    h = jnp.maximum(lin(h, w2, b2), 0.0)
    h = ln(h, g2, be2)
    h = jnp.maximum(lin(h, w3, b3), 0.0)
    return lin(h, w4, b4)


if __name__ == "__main__":
    state_dim = 16
    n_actions = 8
    batch = 8

    key = jax.random.PRNGKey(0)
    kx, kp = jax.random.split(key)
    state = jax.random.normal(kx, (batch, state_dim), jnp.float32)
    params = init_params(kp, state_dim, n_actions)

    q = dqn_forward(state, params)
    q = jax.block_until_ready(q)
    q_ref = dqn_reference(state, params)
    assert q.shape == (batch, n_actions)
    assert jnp.allclose(q, q_ref, atol=5e-3, rtol=5e-3), "mismatch vs JAX reference (B=8)"

    # Exercise the batch-grid + padding path (grid > 1, batch not a tile multiple).
    batch2 = 300
    state2 = jax.random.normal(jax.random.PRNGKey(1), (batch2, state_dim), jnp.float32)
    q2 = jax.block_until_ready(dqn_forward(state2, params, tb=128))
    q2_ref = dqn_reference(state2, params)
    assert q2.shape == (batch2, n_actions)
    assert jnp.allclose(q2, q2_ref, atol=5e-3, rtol=5e-3), "mismatch vs JAX reference (B=300)"

    print("KERNEL_OK")
</pallas_src>

<mosaic_0001>
module attributes {stable_mosaic.version = 11 : i64} {
  func.func @dqn_kernel(%arg0: i32, %arg1: memref<8x16xf32, #tpu.memory_space<vmem>>, %arg2: memref<16x256xbf16, #tpu.memory_space<vmem>>, %arg3: memref<1x256xf32, #tpu.memory_space<vmem>>, %arg4: memref<1x256xf32, #tpu.memory_space<vmem>>, %arg5: memref<1x256xf32, #tpu.memory_space<vmem>>, %arg6: memref<256x256xbf16, #tpu.memory_space<vmem>>, %arg7: memref<1x256xf32, #tpu.memory_space<vmem>>, %arg8: memref<1x256xf32, #tpu.memory_space<vmem>>, %arg9: memref<1x256xf32, #tpu.memory_space<vmem>>, %arg10: memref<256x256xbf16, #tpu.memory_space<vmem>>, %arg11: memref<1x256xf32, #tpu.memory_space<vmem>>, %arg12: memref<256x128xbf16, #tpu.memory_space<vmem>>, %arg13: memref<1x128xf32, #tpu.memory_space<vmem>>, %arg14: memref<8x128xf32, #tpu.memory_space<vmem>>) attributes {dimension_semantics = [#tpu.dimension_semantics<parallel>], iteration_bounds = array<i64: 1>, scalar_prefetch = 0 : i64, scratch_operands = 0 : i64, tpu.core_type = #tpu.core_type<tc>, window_params = [{transform_indices = @transform_0, window_bounds = array<i64: 8, 16>}, {pipeline_mode = #tpu.pipeline_mode<synchronous>, transform_indices = @transform_1, window_bounds = array<i64: 16, 256>}, {pipeline_mode = #tpu.pipeline_mode<synchronous>, transform_indices = @transform_2, window_bounds = array<i64: 1, 256>}, {pipeline_mode = #tpu.pipeline_mode<synchronous>, transform_indices = @transform_3, window_bounds = array<i64: 1, 256>}, {pipeline_mode = #tpu.pipeline_mode<synchronous>, transform_indices = @transform_4, window_bounds = array<i64: 1, 256>}, {pipeline_mode = #tpu.pipeline_mode<synchronous>, transform_indices = @transform_5, window_bounds = array<i64: 256, 256>}, {pipeline_mode = #tpu.pipeline_mode<synchronous>, transform_indices = @transform_6, window_bounds = array<i64: 1, 256>}, {pipeline_mode = #tpu.pipeline_mode<synchronous>, transform_indices = @transform_7, window_bounds = array<i64: 1, 256>}, {pipeline_mode = #tpu.pipeline_mode<synchronous>, transform_indices = @transform_8, window_bounds = array<i64: 1, 256>}, {pipeline_mode = #tpu.pipeline_mode<synchronous>, transform_indices = @transform_9, window_bounds = array<i64: 256, 256>}, {pipeline_mode = #tpu.pipeline_mode<synchronous>, transform_indices = @transform_10, window_bounds = array<i64: 1, 256>}, {pipeline_mode = #tpu.pipeline_mode<synchronous>, transform_indices = @transform_11, window_bounds = array<i64: 256, 128>}, {pipeline_mode = #tpu.pipeline_mode<synchronous>, transform_indices = @transform_12, window_bounds = array<i64: 1, 128>}, {transform_indices = @transform_13, window_bounds = array<i64: 8, 128>}]} {
    %c0 = arith.constant 0 : index
    %c0_0 = arith.constant 0 : index
    %0 = vector.load %arg1[%c0, %c0_0] : memref<8x16xf32, #tpu.memory_space<vmem>>, vector<8x16xf32>
    %1 = arith.truncf %0 : vector<8x16xf32> to vector<8x16xbf16>
    %c0_1 = arith.constant 0 : index
    %c0_2 = arith.constant 0 : index
    %2 = vector.load %arg2[%c0_1, %c0_2] : memref<16x256xbf16, #tpu.memory_space<vmem>>, vector<16x256xbf16>
    %cst = arith.constant dense<0.000000e+00> : vector<8x256xf32>
    %3 = tpu.matmul %1, %2, %cst {dimension_numbers = #tpu.dot_dimension_numbers<[1], [0], [0], [1], [0, 0, 1, 1], [], []>} : vector<8x16xbf16>, vector<16x256xbf16>, vector<8x256xf32> -> vector<8x256xf32>
    %c0_3 = arith.constant 0 : index
    %c0_4 = arith.constant 0 : index
    %4 = vector.load %arg3[%c0_3, %c0_4] : memref<1x256xf32, #tpu.memory_space<vmem>>, vector<1x256xf32>
    %5 = vector.broadcast %4 : vector<1x256xf32> to vector<8x256xf32>
    %6 = arith.addf %3, %5 : vector<8x256xf32>
    %cst_5 = arith.constant 0.000000e+00 : f32
    %7 = vector.broadcast %cst_5 : f32 to vector<8x256xf32>
    %8 = arith.maximumf %6, %7 : vector<8x256xf32>
    %c0_6 = arith.constant 0 : index
    %c0_7 = arith.constant 0 : index
    %9 = vector.load %arg4[%c0_6, %c0_7] : memref<1x256xf32, #tpu.memory_space<vmem>>, vector<1x256xf32>
    %c0_8 = arith.constant 0 : index
    %c0_9 = arith.constant 0 : index
    %10 = vector.load %arg5[%c0_8, %c0_9] : memref<1x256xf32, #tpu.memory_space<vmem>>, vector<1x256xf32>
    %cst_10 = arith.constant dense<0.000000e+00> : vector<8xf32>
    %11 = vector.multi_reduction <add>, %8, %cst_10 [1] : vector<8x256xf32> to vector<8xf32>
    %12 = vector.shape_cast %11 : vector<8xf32> to vector<8x1xf32>
    %cst_11 = arith.constant 2.560000e+02 : f32
    %13 = vector.broadcast %cst_11 : f32 to vector<8x1xf32>
    %14 = arith.divf %12, %13 : vector<8x1xf32>
    %15 = arith.mulf %8, %8 : vector<8x256xf32>
    %cst_12 = arith.constant dense<0.000000e+00> : vector<8xf32>
    %16 = vector.multi_reduction <add>, %15, %cst_12 [1] : vector<8x256xf32> to vector<8xf32>
    %17 = vector.shape_cast %16 : vector<8xf32> to vector<8x1xf32>
    %cst_13 = arith.constant 2.560000e+02 : f32
    %18 = vector.broadcast %cst_13 : f32 to vector<8x1xf32>
    %19 = arith.divf %17, %18 : vector<8x1xf32>
    %20 = arith.mulf %14, %14 : vector<8x1xf32>
    %21 = arith.subf %19, %20 : vector<8x1xf32>
    %cst_14 = arith.constant 9.99999974E-6 : f32
    %22 = vector.broadcast %cst_14 : f32 to vector<8x1xf32>
    %23 = arith.addf %21, %22 : vector<8x1xf32>
    %24 = math.rsqrt %23 : vector<8x1xf32>
    %25 = vector.broadcast %9 : vector<1x256xf32> to vector<8x256xf32>
    %26 = vector.broadcast %24 : vector<8x1xf32> to vector<8x256xf32>
    %27 = arith.mulf %25, %26 : vector<8x256xf32>
    %28 = vector.broadcast %14 : vector<8x1xf32> to vector<8x256xf32>
    %29 = arith.subf %8, %28 : vector<8x256xf32>
    %30 = arith.mulf %29, %27 : vector<8x256xf32>
    %31 = vector.broadcast %10 : vector<1x256xf32> to vector<8x256xf32>
    %32 = arith.addf %30, %31 : vector<8x256xf32>
    %33 = arith.truncf %32 : vector<8x256xf32> to vector<8x256xbf16>
    %c0_15 = arith.constant 0 : index
    %c0_16 = arith.constant 0 : index
    %34 = vector.load %arg6[%c0_15, %c0_16] : memref<256x256xbf16, #tpu.memory_space<vmem>>, vector<256x256xbf16>
    %cst_17 = arith.constant dense<0.000000e+00> : vector<8x256xf32>
    %35 = tpu.matmul %33, %34, %cst_17 {dimension_numbers = #tpu.dot_dimension_numbers<[1], [0], [0], [1], [0, 0, 1, 1], [], []>} : vector<8x256xbf16>, vector<256x256xbf16>, vector<8x256xf32> -> vector<8x256xf32>
    %c0_18 = arith.constant 0 : index
    %c0_19 = arith.constant 0 : index
    %36 = vector.load %arg7[%c0_18, %c0_19] : memref<1x256xf32, #tpu.memory_space<vmem>>, vector<1x256xf32>
    %37 = vector.broadcast %36 : vector<1x256xf32> to vector<8x256xf32>
    %38 = arith.addf %35, %37 : vector<8x256xf32>
    %cst_20 = arith.constant 0.000000e+00 : f32
    %39 = vector.broadcast %cst_20 : f32 to vector<8x256xf32>
    %40 = arith.maximumf %38, %39 : vector<8x256xf32>
    %c0_21 = arith.constant 0 : index
    %c0_22 = arith.constant 0 : index
    %41 = vector.load %arg8[%c0_21, %c0_22] : memref<1x256xf32, #tpu.memory_space<vmem>>, vector<1x256xf32>
    %c0_23 = arith.constant 0 : index
    %c0_24 = arith.constant 0 : index
    %42 = vector.load %arg9[%c0_23, %c0_24] : memref<1x256xf32, #tpu.memory_space<vmem>>, vector<1x256xf32>
    %cst_25 = arith.constant dense<0.000000e+00> : vector<8xf32>
    %43 = vector.multi_reduction <add>, %40, %cst_25 [1] : vector<8x256xf32> to vector<8xf32>
    %44 = vector.shape_cast %43 : vector<8xf32> to vector<8x1xf32>
    %cst_26 = arith.constant 2.560000e+02 : f32
    %45 = vector.broadcast %cst_26 : f32 to vector<8x1xf32>
    %46 = arith.divf %44, %45 : vector<8x1xf32>
    %47 = arith.mulf %40, %40 : vector<8x256xf32>
    %cst_27 = arith.constant dense<0.000000e+00> : vector<8xf32>
    %48 = vector.multi_reduction <add>, %47, %cst_27 [1] : vector<8x256xf32> to vector<8xf32>
    %49 = vector.shape_cast %48 : vector<8xf32> to vector<8x1xf32>
    %cst_28 = arith.constant 2.560000e+02 : f32
    %50 = vector.broadcast %cst_28 : f32 to vector<8x1xf32>
    %51 = arith.divf %49, %50 : vector<8x1xf32>
    %52 = arith.mulf %46, %46 : vector<8x1xf32>
    %53 = arith.subf %51, %52 : vector<8x1xf32>
    %cst_29 = arith.constant 9.99999974E-6 : f32
    %54 = vector.broadcast %cst_29 : f32 to vector<8x1xf32>
    %55 = arith.addf %53, %54 : vector<8x1xf32>
    %56 = math.rsqrt %55 : vector<8x1xf32>
    %57 = vector.broadcast %41 : vector<1x256xf32> to vector<8x256xf32>
    %58 = vector.broadcast %56 : vector<8x1xf32> to vector<8x256xf32>
    %59 = arith.mulf %57, %58 : vector<8x256xf32>
    %60 = vector.broadcast %46 : vector<8x1xf32> to vector<8x256xf32>
    %61 = arith.subf %40, %60 : vector<8x256xf32>
    %62 = arith.mulf %61, %59 : vector<8x256xf32>
    %63 = vector.broadcast %42 : vector<1x256xf32> to vector<8x256xf32>
    %64 = arith.addf %62, %63 : vector<8x256xf32>
    %65 = arith.truncf %64 : vector<8x256xf32> to vector<8x256xbf16>
    %c0_30 = arith.constant 0 : index
    %c0_31 = arith.constant 0 : index
    %66 = vector.load %arg10[%c0_30, %c0_31] : memref<256x256xbf16, #tpu.memory_space<vmem>>, vector<256x256xbf16>
    %cst_32 = arith.constant dense<0.000000e+00> : vector<8x256xf32>
    %67 = tpu.matmul %65, %66, %cst_32 {dimension_numbers = #tpu.dot_dimension_numbers<[1], [0], [0], [1], [0, 0, 1, 1], [], []>} : vector<8x256xbf16>, vector<256x256xbf16>, vector<8x256xf32> -> vector<8x256xf32>
    %c0_33 = arith.constant 0 : index
    %c0_34 = arith.constant 0 : index
    %68 = vector.load %arg11[%c0_33, %c0_34] : memref<1x256xf32, #tpu.memory_space<vmem>>, vector<1x256xf32>
    %69 = vector.broadcast %68 : vector<1x256xf32> to vector<8x256xf32>
    %70 = arith.addf %67, %69 : vector<8x256xf32>
    %cst_35 = arith.constant 0.000000e+00 : f32
    %71 = vector.broadcast %cst_35 : f32 to vector<8x256xf32>
    %72 = arith.maximumf %70, %71 : vector<8x256xf32>
    %73 = arith.truncf %72 : vector<8x256xf32> to vector<8x256xbf16>
    %c0_36 = arith.constant 0 : index
    %c0_37 = arith.constant 0 : index
    %74 = vector.load %arg12[%c0_36, %c0_37] : memref<256x128xbf16, #tpu.memory_space<vmem>>, vector<256x128xbf16>
    %cst_38 = arith.constant dense<0.000000e+00> : vector<8x128xf32>
    %75 = tpu.matmul %73, %74, %cst_38 {dimension_numbers = #tpu.dot_dimension_numbers<[1], [0], [0], [1], [0, 0, 1, 1], [], []>} : vector<8x256xbf16>, vector<256x128xbf16>, vector<8x128xf32> -> vector<8x128xf32>
    %c0_39 = arith.constant 0 : index
    %c0_40 = arith.constant 0 : index
    %76 = vector.load %arg13[%c0_39, %c0_40] : memref<1x128xf32, #tpu.memory_space<vmem>>, vector<1x128xf32>
    %77 = vector.broadcast %76 : vector<1x128xf32> to vector<8x128xf32>
    %78 = arith.addf %75, %77 : vector<8x128xf32>
    %c0_41 = arith.constant 0 : index
    %c0_42 = arith.constant 0 : index
    %79 = vector.load %arg14[%c0_41, %c0_42] : memref<8x128xf32, #tpu.memory_space<vmem>>, vector<8x128xf32>
    tpu.vector_store %arg14[%c0_41, %c0_42], %78 {strides = array<i32>} : memref<8x128xf32, #tpu.memory_space<vmem>>, vector<8x128xf32>,
    return
  }
  func.func @transform_0(%arg0: i32) -> (i32, i32) {
    %c0_i32 = arith.constant 0 : i32
    %c0_i32_0 = arith.constant 0 : i32
    return %arg0, %c0_i32 : i32, i32
  }
  func.func @transform_1(%arg0: i32) -> (i32, i32) {
    %c0_i32 = arith.constant 0 : i32
    %c0_i32_0 = arith.constant 0 : i32
    %c0_i32_1 = arith.constant 0 : i32
    return %c0_i32, %c0_i32_0 : i32, i32
  }
  func.func @transform_2(%arg0: i32) -> (i32, i32) {
    %c0_i32 = arith.constant 0 : i32
    %c0_i32_0 = arith.constant 0 : i32
    %c0_i32_1 = arith.constant 0 : i32
    return %c0_i32, %c0_i32_0 : i32, i32
  }
  func.func @transform_3(%arg0: i32) -> (i32, i32) {
    %c0_i32 = arith.constant 0 : i32
    %c0_i32_0 = arith.constant 0 : i32
    %c0_i32_1 = arith.constant 0 : i32
    return %c0_i32, %c0_i32_0 : i32, i32
  }
  func.func @transform_4(%arg0: i32) -> (i32, i32) {
    %c0_i32 = arith.constant 0 : i32
    %c0_i32_0 = arith.constant 0 : i32
    %c0_i32_1 = arith.constant 0 : i32
    return %c0_i32, %c0_i32_0 : i32, i32
  }
  func.func @transform_5(%arg0: i32) -> (i32, i32) {
    %c0_i32 = arith.constant 0 : i32
    %c0_i32_0 = arith.constant 0 : i32
    %c0_i32_1 = arith.constant 0 : i32
    return %c0_i32, %c0_i32_0 : i32, i32
  }
  func.func @transform_6(%arg0: i32) -> (i32, i32) {
    %c0_i32 = arith.constant 0 : i32
    %c0_i32_0 = arith.constant 0 : i32
    %c0_i32_1 = arith.constant 0 : i32
    return %c0_i32, %c0_i32_0 : i32, i32
  }
  func.func @transform_7(%arg0: i32) -> (i32, i32) {
    %c0_i32 = arith.constant 0 : i32
    %c0_i32_0 = arith.constant 0 : i32
    %c0_i32_1 = arith.constant 0 : i32
    return %c0_i32, %c0_i32_0 : i32, i32
  }
  func.func @transform_8(%arg0: i32) -> (i32, i32) {
    %c0_i32 = arith.constant 0 : i32
    %c0_i32_0 = arith.constant 0 : i32
    %c0_i32_1 = arith.constant 0 : i32
    return %c0_i32, %c0_i32_0 : i32, i32
  }
  func.func @transform_9(%arg0: i32) -> (i32, i32) {
    %c0_i32 = arith.constant 0 : i32
    %c0_i32_0 = arith.constant 0 : i32
    %c0_i32_1 = arith.constant 0 : i32
    return %c0_i32, %c0_i32_0 : i32, i32
  }
  func.func @transform_10(%arg0: i32) -> (i32, i32) {
    %c0_i32 = arith.constant 0 : i32
    %c0_i32_0 = arith.constant 0 : i32
    %c0_i32_1 = arith.constant 0 : i32
    return %c0_i32, %c0_i32_0 : i32, i32
  }
  func.func @transform_11(%arg0: i32) -> (i32, i32) {
    %c0_i32 = arith.constant 0 : i32
    %c0_i32_0 = arith.constant 0 : i32
    %c0_i32_1 = arith.constant 0 : i32
    return %c0_i32, %c0_i32_0 : i32, i32
  }
  func.func @transform_12(%arg0: i32) -> (i32, i32) {
    %c0_i32 = arith.constant 0 : i32
    %c0_i32_0 = arith.constant 0 : i32
    %c0_i32_1 = arith.constant 0 : i32
    return %c0_i32, %c0_i32_0 : i32, i32
  }
  func.func @transform_13(%arg0: i32) -> (i32, i32) {
    %c0_i32 = arith.constant 0 : i32
    %c0_i32_0 = arith.constant 0 : i32
    return %arg0, %c0_i32 : i32, i32
  }
}

</mosaic_0001>

<bundles_post_ra>
// kernel: dqn_forward.1
= control target key start
LH: loop header
LB: loop body
LE: loop exit
PB: predicated region body
PF: predicated region fallthrough
CT: control target
= control target key end

     0   :  { %18 = vsyncpa [#allocation3], 0  ;;  %s1501_s0 = inlined_call_operand.vmem [shape: f32[8,16], index: 0, kind: input, shape index: {}]   ;;  %s1502_s1 = inlined_call_operand.vmem [shape: bf16[16,256], index: 1, kind: input, shape index: {}]   ;;  %s1503_s2 = inlined_call_operand.vmem [shape: f32[1,256], index: 2, kind: input, shape index: {}]   ;;  %s1504_s3 = inlined_call_operand.vmem [shape: f32[1,256], index: 3, kind: input, shape index: {}]   ;;  %s1505_s4 = inlined_call_operand.vmem [shape: f32[1,256], index: 4, kind: input, shape index: {}]   ;;  %s1506_s5 = inlined_call_operand.vmem [shape: bf16[256,256], index: 5, kind: input, shape index: {}]   ;;  %s1507_s6 = inlined_call_operand.vmem [shape: f32[1,256], index: 6, kind: input, shape index: {}]   ;;  %s1508_s7 = inlined_call_operand.vmem [shape: f32[1,256], index: 7, kind: input, shape index: {}]   ;;  %s1509_s8 = inlined_call_operand.vmem [shape: f32[1,256], index: 8, kind: input, shape index: {}]   ;;  %s1510_s9 = inlined_call_operand.hbm [shape: bf16[256,256], index: 9, kind: input, shape index: {}]   ;;  %s1511_s10 = inlined_call_operand.vmem [shape: f32[1,256], index: 10, kind: input, shape index: {}]   ;;  %s1512_s11 = inlined_call_operand.vmem [shape: bf16[256,128], index: 11, kind: input, shape index: {}]   ;;  %s1513_s12 = inlined_call_operand.vmem [shape: f32[1,128], index: 12, kind: input, shape index: {}]   ;;  %s1514_s13 = inlined_call_operand.hbm [shape: f32[8,128], index: 13, kind: output, shape index: {}]  }
   0x1   :  { %19 = vsyncpa [#allocation4], 0  ;;  %s1195_s25 = smov [#allocation2]   ;;  %s1147_s29 = scalar_lea.hbm %s1510_s9, 4096 }
   0x2   :  { %s43_s26 = sshll.u32 %s1195_s25, 4  ;;  %p1148_p0 = scmp.ne.s32.totalorder %s1510_s9, %s1147_s29  ;;  %s44_s26 = int_to_ptr.vmem [resolvable:$true] %s43_s26 }
   0x3   :  { %p1151_p1 = scmp.lt.u32.totalorder %s1147_s29, %s1510_s9 }
   0x5   :  { %p1153_p2 = pnand %p1151_p1, %p1148_p0 }
   0x7   :  { %1156 = shalt.err (!%p1153_p2)
}
   0x8   :  { %s1157_s17 = scalar_lea.vmem %s44_s26, 4096  ;;  %p1162_p4 = scmp.lt.s32.totalorder %s44_s26, %s44_s26 }
   0x9   :  { %p1158_p3 = scmp.ne.s32.totalorder %s44_s26, %s1157_s17  ;;  %p1163_p5 = scmp.lt.s32.totalorder %s1157_s17, %s1157_s17 }
   0xb   :  { %p1164_p6 = por %p1163_p5, %p1162_p4 }
   0xd   :  { %p1165_p7 = pnand %p1164_p6, %p1158_p3 }
   0xf   :  { %1168 = shalt.err (!%p1165_p7)
}
  0x10   :  { %s1196_s18 = smov 128   ;;  %s1197_s19 = smov 8  }
  0x11   :  { %49 = dma.hbm_to_vmem [thread:$0]  %s1510_s9, 4096, %s44_s26, [#allocation3], %s1196_s18, %s1196_s18, %s1197_s19  }
  0x12   :  { %1191 = dma.done.wait [#allocation3], 4096  }
  0x13   :  { %1192 = vsyncadd [#allocation3], 4294963200  ;;  %v1198_v0 = vmov 0   ;;  %v1028_v1 = vld [vmem:[%s1502_s1 + $0x4] ss:$8 sps:$4 sm:$0xff]   ;;  %vm86_vm0 = vcmask 130048   ;;  %v66_v23 = vlaneseq }
  0x14   :  { %122 = vmatprep.mubr.bf16.mxu0 %v1198_v0  ;;  %v1030_v2 = vld [vmem:[%s1502_s1] ss:$8 sps:$4 sm:$0xff]   ;;  %90 = vmatprep.subr.bf16.mxu0 %v1028_v1  ;;  %v1031_v5 = vld [vmem:[%s1506_s5 + $0x4] ss:$8 sps:$4 sm:$0xff]   ;;  %v1034_v7 = vld [vmem:[%s1506_s5 + $0x14] ss:$8 sps:$4 sm:$0xff]  }
  0x15   :  { %v60_v3 = vld [vmem:[%s1501_s0] sm:$0xff]  ;;  %91 = vmatpush1.bf16.msra.mxu0 %v1030_v2  ;;  %386 = vmatprep.subr.bf16.mxu1 %v1031_v5  ;;  %v1036_v8 = vld [vmem:[%s1506_s5 + $0x10] ss:$8 sps:$4 sm:$0xff]   ;;  %v1040_v11 = vld [vmem:[%s1506_s5 + $0x34] ss:$8 sps:$4 sm:$0xff]   ;;  %v67_v24 = vshrl.u32 %v66_v23, 7 }
  0x16   :  { %v61_v4 = vpack.c.bf16 %v60_v3, %v60_v3  ;;  %v1033_v6 = vld [vmem:[%s1506_s5] ss:$8 sps:$4 sm:$0xff]   ;;  %v1037_v9 = vld [vmem:[%s1506_s5 + $0x24] ss:$8 sps:$4 sm:$0xff]   ;;  %v1042_v12 = vld [vmem:[%s1506_s5 + $0x30] ss:$8 sps:$4 sm:$0xff]  }
  0x17   :  { %387 = vmatpush1.bf16.msra.mxu1 %v1033_v6  ;;  %v1039_v10 = vld [vmem:[%s1506_s5 + $0x20] ss:$8 sps:$4 sm:$0xff]   ;;  %v1043_v13 = vld [vmem:[%s1506_s5 + $0x44] ss:$8 sps:$4 sm:$0xff]   ;;  %v1046_v15 = vld [vmem:[%s1506_s5 + $0x54] ss:$8 sps:$4 sm:$0xff]  }
  0x18   :  { %919 = vmatmul.mubr.msk.bf16.vlgmr.msra.gmra.mrb[0].mxu0 %vm86_vm0, %v61_v4  ;;  %388 = vmatprep.subr.bf16.mxu1 %v1034_v7  ;;  %v1045_v14 = vld [vmem:[%s1506_s5 + $0x40] ss:$8 sps:$4 sm:$0xff]   ;;  %v1048_v16 = vld [vmem:[%s1506_s5 + $0x50] ss:$8 sps:$4 sm:$0xff]   ;;  %v1049_v17 = vld [vmem:[%s1506_s5 + $0x64] ss:$8 sps:$4 sm:$0xff]  }
  0x19   :  { %v1051_v18 = vld [vmem:[%s1506_s5 + $0x60] ss:$8 sps:$4 sm:$0xff]   ;;  %v1052_v19 = vld [vmem:[%s1506_s5 + $0x74] ss:$8 sps:$4 sm:$0xff]   ;;  %v1054_v20 = vld [vmem:[%s1506_s5 + $0x70] ss:$8 sps:$4 sm:$0xff]  }
  0x1a   :  { %v1055_v21 = vld [vmem:[%s1506_s5 + $0x84] ss:$8 sps:$4 sm:$0xff]   ;;  %v1057_v22 = vld [vmem:[%s1506_s5 + $0x80] ss:$8 sps:$4 sm:$0xff]   ;;  %v1345_v25 = vsub.s32 0, %v67_v24  ;;  %v1350_v27 = vsub.s32 1, %v67_v24 }
  0x1b   :  { %389 = vmatpush1.bf16.msra.mxu1 %v1036_v8  ;;  %v64_v26 = vld [vmem:[%s1503_s2] sm:$0x3]  ;;  %v1058_v42 = vld [vmem:[%s1506_s5 + $0x94] ss:$8 sps:$4 sm:$0xff]   ;;  %v1060_v43 = vld [vmem:[%s1506_s5 + $0x90] ss:$8 sps:$4 sm:$0xff]  }
  0x1c   :  { %390 = vmatprep.subr.bf16.mxu1 %v1037_v9  ;;  %v69_v28 = vrot.slane %v64_v26, %v1345_v25  ;;  %v73_v29 = vrot.slane %v64_v26, %v1350_v27  ;;  %v1061_v44 = vld [vmem:[%s1506_s5 + $0xa4] ss:$8 sps:$4 sm:$0xff]   ;;  %v1063_v45 = vld [vmem:[%s1506_s5 + $0xa0] ss:$8 sps:$4 sm:$0xff]   ;;  %v1064_v46 = vld [vmem:[%s1506_s5 + $0xb4] ss:$8 sps:$4 sm:$0xff]  }
  0x1d   :  { %v1066_v47 = vld [vmem:[%s1506_s5 + $0xb0] ss:$8 sps:$4 sm:$0xff]   ;;  %v1067_v48 = vld [vmem:[%s1506_s5 + $0xc4] ss:$8 sps:$4 sm:$0xff]   ;;  %v1069_v49 = vld [vmem:[%s1506_s5 + $0xc0] ss:$8 sps:$4 sm:$0xff]  }
  0x1e   :  { %v1070_v50 = vld [vmem:[%s1506_s5 + $0xd4] ss:$8 sps:$4 sm:$0xff]   ;;  %v1072_v51 = vld [vmem:[%s1506_s5 + $0xd0] ss:$8 sps:$4 sm:$0xff]   ;;  %v1073_v52 = vld [vmem:[%s1506_s5 + $0xe4] ss:$8 sps:$4 sm:$0xff]  }
  0x1f   :  { %391 = vmatpush1.bf16.msra.mxu1 %v1039_v10  ;;  %v1075_v53 = vld [vmem:[%s1506_s5 + $0xe0] ss:$8 sps:$4 sm:$0xff]   ;;  %v1076_v54 = vld [vmem:[%s1506_s5 + $0xf4] ss:$8 sps:$4 sm:$0xff]   ;;  %v1078_v55 = vld [vmem:[%s1506_s5 + $0xf0] ss:$8 sps:$4 sm:$0xff]  }
  0x20   :  { %392 = vmatprep.subr.bf16.mxu1 %v1040_v11  ;;  %v133_v63 = vld [vmem:[%s1504_s3] sm:$0x3]  ;;  %v1088_v23 = vld [vmem:[#allocation2 + $0x30] ss:$8 sps:$4 sm:$0xff]   ;;  %v1093_v24 = vld [vmem:[#allocation2 + $0x44] ss:$8 sps:$4 sm:$0xff]  }
  0x21   :  { %v134_v0 = vld [vmem:[%s1505_s4] sm:$0x3]  ;;  %v154_v1 = vrot.slane %v133_v63, %v1345_v25  ;;  %v158_v2 = vrot.slane %v133_v63, %v1350_v27  ;;  %v1126_v63 = vld [vmem:[#allocation2 + $0xf4] ss:$8 sps:$4 sm:$0xff]  }
  0x22   :  { %v171_v4 = vrot.slane %v134_v0, %v1345_v25  ;;  %v175_v5 = vrot.slane %v134_v0, %v1350_v27  ;;  %v1091_v26 = vld [vmem:[#allocation2 + $0x40] ss:$8 sps:$4 sm:$0xff]   ;;  %v1124_v0 = vld [vmem:[#allocation2 + $0xf0] ss:$8 sps:$4 sm:$0xff]  }
  0x23   :  { %393 = vmatpush1.bf16.msra.mxu1 %v1042_v12 }
  0x24   :  { %394 = vmatprep.subr.bf16.mxu1 %v1043_v13 }
  0x27   :  { %395 = vmatpush1.bf16.msra.mxu1 %v1045_v14 }
  0x28   :  { %396 = vmatprep.subr.bf16.mxu1 %v1046_v15 }
  0x2b   :  { %397 = vmatpush1.bf16.msra.mxu1 %v1048_v16  ;;  %v1079_v16 = vld [vmem:[#allocation2] ss:$8 sps:$4 sm:$0xff]  }
  0x2c   :  { %398 = vmatprep.subr.bf16.mxu1 %v1049_v17  ;;  %v1081_v17 = vld [vmem:[#allocation2 + $0x4] ss:$8 sps:$4 sm:$0xff]  }
  0x2d   :  { %681 = vmatprep.subr.bf16.mxu0 %v1081_v17 }
  0x2e   :  { %682 = vmatpush1.bf16.msra.mxu0 %v1079_v16 }
  0x2f   :  { %399 = vmatpush1.bf16.msra.mxu1 %v1051_v18  ;;  %v1084_v18 = vld [vmem:[#allocation2 + $0x14] ss:$8 sps:$4 sm:$0xff]  }
  0x30   :  { %400 = vmatprep.subr.bf16.mxu1 %v1052_v19  ;;  %v1082_v19 = vld [vmem:[#allocation2 + $0x10] ss:$8 sps:$4 sm:$0xff]   ;;  %683 = vmatprep.subr.bf16.mxu0 %v1084_v18 }
  0x32   :  { %684 = vmatpush1.bf16.msra.mxu0 %v1082_v19 }
  0x33   :  { %401 = vmatpush1.bf16.msra.mxu1 %v1054_v20  ;;  %v1087_v20 = vld [vmem:[#allocation2 + $0x24] ss:$8 sps:$4 sm:$0xff]  }
  0x34   :  { %402 = vmatprep.subr.bf16.mxu1 %v1055_v21  ;;  %v1085_v21 = vld [vmem:[#allocation2 + $0x20] ss:$8 sps:$4 sm:$0xff]   ;;  %685 = vmatprep.subr.bf16.mxu0 %v1087_v20 }
  0x35   :  { %v429_v20 = vld [vmem:[%s1508_s7] sm:$0x3] }
  0x36   :  { %686 = vmatpush1.bf16.msra.mxu0 %v1085_v21  ;;  %v430_v21 = vld [vmem:[%s1509_s8] sm:$0x3] }
  0x37   :  { %403 = vmatpush1.bf16.msra.mxu1 %v1057_v22  ;;  %v1090_v22 = vld [vmem:[#allocation2 + $0x34] ss:$8 sps:$4 sm:$0xff]  }
  0x38   :  { %404 = vmatprep.subr.bf16.mxu1 %v1058_v42  ;;  %687 = vmatprep.subr.bf16.mxu0 %v1090_v22  ;;  %v449_v22 = vrot.slane %v429_v20, %v1345_v25 }
  0x3a   :  { %688 = vmatpush1.bf16.msra.mxu0 %v1088_v23  ;;  %v453_v23 = vrot.slane %v429_v20, %v1350_v27 }
  0x3b   :  { %405 = vmatpush1.bf16.msra.mxu1 %v1060_v43  ;;  %689 = vmatprep.subr.bf16.mxu0 %v1093_v24 }
  0x3c   :  { %406 = vmatprep.subr.bf16.mxu1 %v1061_v44 }
  0x3e   :  { %690 = vmatpush1.bf16.msra.mxu0 %v1091_v26  ;;  %v466_v26 = vrot.slane %v430_v21, %v1345_v25 }
  0x3f   :  { %407 = vmatpush1.bf16.msra.mxu1 %v1063_v45 }
  0x40   :  { %408 = vmatprep.subr.bf16.mxu1 %v1064_v46 }
  0x43   :  { %409 = vmatpush1.bf16.msra.mxu1 %v1066_v47 }
  0x44   :  { %410 = vmatprep.subr.bf16.mxu1 %v1067_v48 }
  0x47   :  { %411 = vmatpush1.bf16.msra.mxu1 %v1069_v49 }
  0x48   :  { %412 = vmatprep.subr.bf16.mxu1 %v1070_v50 }
  0x4b   :  { %413 = vmatpush1.bf16.msra.mxu1 %v1072_v51  ;;  %v1108_v51 = vld [vmem:[#allocation2 + $0x94] ss:$8 sps:$4 sm:$0xff]  }
  0x4c   :  { %414 = vmatprep.subr.bf16.mxu1 %v1073_v52  ;;  %v1106_v52 = vld [vmem:[#allocation2 + $0x90] ss:$8 sps:$4 sm:$0xff]  }
  0x4f   :  { %415 = vmatpush1.bf16.msra.mxu1 %v1075_v53  ;;  %v1111_v53 = vld [vmem:[#allocation2 + $0xa4] ss:$8 sps:$4 sm:$0xff]  }
  0x50   :  { %416 = vmatprep.subr.bf16.mxu1 %v1076_v54  ;;  %v1109_v54 = vld [vmem:[#allocation2 + $0xa0] ss:$8 sps:$4 sm:$0xff]  }
  0x53   :  { %417 = vmatpush1.bf16.msra.mxu1 %v1078_v55  ;;  %v1114_v55 = vld [vmem:[#allocation2 + $0xb4] ss:$8 sps:$4 sm:$0xff]  }
  0xeb   :  { %v124_v30 = vpop.f32.mrb[0].mxu0 }
  0xec   :  { %v125_v31 = vadd.f32 %v124_v30, %v69_v28  ;;  %v126_v32 = vpop.f32.mrb[1].mxu0  ;;  %v1096_v28 = vld [vmem:[#allocation2 + $0x54] ss:$8 sps:$4 sm:$0xff]   ;;  %v1099_v30 = vld [vmem:[#allocation2 + $0x64] ss:$8 sps:$4 sm:$0xff]  }
  0xed   :  { %v127_v33 = vadd.f32 %v126_v32, %v73_v29  ;;  %v128_v34 = vpop.f32.mrb[2].mxu0  ;;  %v1094_v29 = vld [vmem:[#allocation2 + $0x50] ss:$8 sps:$4 sm:$0xff]   ;;  %691 = vmatprep.subr.bf16.mxu0 %v1096_v28  ;;  %v1102_v32 = vld [vmem:[#allocation2 + $0x74] ss:$8 sps:$4 sm:$0xff]   ;;  %v470_v28 = vrot.slane %v430_v21, %v1350_v27 }
  0xee   :  { %v131_v35 = vmax.f32 %v125_v31, 0.0  ;;  %v129_v36 = vpop.f32.mrb[3].mxu0  ;;  %692 = vmatpush1.bf16.msra.mxu0 %v1094_v29  ;;  %v1097_v31 = vld [vmem:[#allocation2 + $0x60] ss:$8 sps:$4 sm:$0xff]   ;;  %v1105_v34 = vld [vmem:[#allocation2 + $0x84] ss:$8 sps:$4 sm:$0xff]  }
  0xef   :  { %v132_v37 = vmax.f32 %v127_v33, 0.0  ;;  %693 = vmatprep.subr.bf16.mxu0 %v1099_v30  ;;  %v1100_v33 = vld [vmem:[#allocation2 + $0x70] ss:$8 sps:$4 sm:$0xff]   ;;  %v214_v36 = vld [vmem:[%s1507_s6] sm:$0x3] }
  0xf0   :  { %v140_v39 = vmul.f32 %v131_v35, %v131_v35 }
  0xf1   :  { %v135_v38 = vadd.f32 %v132_v37, %v131_v35  ;;  %v141_v40 = vmul.f32 %v132_v37, %v132_v37 }
  0xf2   :  { %694 = vmatpush1.bf16.msra.mxu0 %v1097_v31 }
  0xf3   :  { %136 = vadd.xlane.f32.xlu0 %v135_v38  ;;  %v142_v41 = vadd.f32 %v141_v40, %v140_v39  ;;  %695 = vmatprep.subr.bf16.mxu0 %v1102_v32  ;;  %v223_v38 = vrot.slane %v214_v36, %v1350_v27 }
  0xf6   :  { %696 = vmatpush1.bf16.msra.mxu0 %v1100_v33 }
  0xf7   :  { %143 = vadd.xlane.f32.xlu0 %v142_v41  ;;  %697 = vmatprep.subr.bf16.mxu0 %v1105_v34 }
 0x180   :  { %v137_v56 = vpop.xlane.xlu0 %136 }
 0x181   :  { %v139_v57 = vmul.f32 0.00390625, %v137_v56  ;;  %v1112_v56 = vld [vmem:[#allocation2 + $0xb0] ss:$8 sps:$4 sm:$0xff]  }
 0x183   :  { %v146_v59 = vmul.f32 %v139_v57, %v139_v57  ;;  %v163_v6 = vsub.f32 %v131_v35, %v139_v57  ;;  %v164_v8 = vsub.f32 %v132_v37, %v139_v57  ;;  %v1103_v35 = vld [vmem:[#allocation2 + $0x80] ss:$8 sps:$4 sm:$0xff]   ;;  %v219_v37 = vrot.slane %v214_v36, %v1345_v25  ;;  %v1117_v57 = vld [vmem:[#allocation2 + $0xc4] ss:$8 sps:$4 sm:$0xff]  }
 0x184   :  { %v144_v58 = vpop.xlane.xlu0 %143  ;;  %698 = vmatpush1.bf16.msra.mxu0 %v1103_v35 }
 0x185   :  { %v145_v60 = vmul.f32 0.00390625, %v144_v58  ;;  %699 = vmatprep.subr.bf16.mxu0 %v1108_v51  ;;  %v1115_v58 = vld [vmem:[#allocation2 + $0xc0] ss:$8 sps:$4 sm:$0xff]  }
 0x187   :  { %v147_v61 = vsub.f32 %v145_v60, %v146_v59  ;;  %v1120_v59 = vld [vmem:[#allocation2 + $0xd4] ss:$8 sps:$4 sm:$0xff]   ;;  %v1118_v60 = vld [vmem:[#allocation2 + $0xd0] ss:$8 sps:$4 sm:$0xff]  }
 0x188   :  { %700 = vmatpush1.bf16.msra.mxu0 %v1106_v52 }
 0x189   :  { %v148_v62 = vadd.f32 1e-05, %v147_v61  ;;  %701 = vmatprep.subr.bf16.mxu0 %v1111_v53  ;;  %v1123_v61 = vld [vmem:[#allocation2 + $0xe4] ss:$8 sps:$4 sm:$0xff]  }
 0x18b   :  { %1143 = vrsqrt.f32 %v148_v62  ;;  %v1121_v62 = vld [vmem:[#allocation2 + $0xe0] ss:$8 sps:$4 sm:$0xff]  }
 0x18c   :  { %702 = vmatpush1.bf16.msra.mxu0 %v1109_v54 }
 0x18d   :  { %703 = vmatprep.subr.bf16.mxu0 %v1114_v55 }
 0x190   :  { %704 = vmatpush1.bf16.msra.mxu0 %v1112_v56 }
 0x191   :  { %705 = vmatprep.subr.bf16.mxu0 %v1117_v57  ;;  %v984_v57 = vld [vmem:[%s1513_s12] ss:$0 sm:$0xff] }
 0x194   :  { %706 = vmatpush1.bf16.msra.mxu0 %v1115_v58 }
 0x195   :  { %v1144_v3 = vpop.eup %1143  ;;  %707 = vmatprep.subr.bf16.mxu0 %v1120_v59 }
 0x196   :  { %v162_v7 = vmul.f32 %v1144_v3, %v158_v2  ;;  %v161_v9 = vmul.f32 %v1144_v3, %v154_v1  ;;  %v1127_v1 = vld [vmem:[%s1512_s11 + $0x40] sm:$0xff]   ;;  %v1129_v3 = vld [vmem:[%s1512_s11 + $0x48] sm:$0xff]  }
 0x197   :  { %v1128_v2 = vld [vmem:[%s1512_s11] sm:$0xff]   ;;  %1001 = vmatprep.subr.bf16.mxu1 %v1127_v1 }
 0x198   :  { %v166_v10 = vmul.f32 %v164_v8, %v162_v7  ;;  %v165_v11 = vmul.f32 %v163_v6, %v161_v9  ;;  %708 = vmatpush1.bf16.msra.mxu0 %v1118_v60  ;;  %v1132_v6 = vld [vmem:[%s1512_s11 + $0x10] sm:$0xff]   ;;  %v1133_v7 = vld [vmem:[%s1512_s11 + $0x58] sm:$0xff]   ;;  %v1135_v9 = vld [vmem:[%s1512_s11 + $0x60] sm:$0xff]  }
 0x199   :  { %709 = vmatprep.subr.bf16.mxu0 %v1123_v61  ;;  %v1134_v8 = vld [vmem:[%s1512_s11 + $0x18] sm:$0xff]  }
 0x19a   :  { %v179_v12 = vadd.f32 %v175_v5, %v166_v10  ;;  %v178_v13 = vadd.f32 %v171_v4, %v165_v11  ;;  %v1130_v4 = vld [vmem:[%s1512_s11 + $0x8] sm:$0xff]   ;;  %v1131_v5 = vld [vmem:[%s1512_s11 + $0x50] sm:$0xff]   ;;  %v1136_v10 = vld [vmem:[%s1512_s11 + $0x20] sm:$0xff]  }
 0x19b   :  { %v1137_v11 = vld [vmem:[%s1512_s11 + $0x68] sm:$0xff]  }
 0x19c   :  { %v181_v14 = vpack.c.bf16 %v179_v12, %v179_v12  ;;  %v180_v15 = vpack.c.bf16 %v178_v13, %v178_v13  ;;  %710 = vmatpush1.bf16.msra.mxu0 %v1121_v62  ;;  %v1138_v12 = vld [vmem:[%s1512_s11 + $0x28] sm:$0xff]  }
 0x19d   :  { %711 = vmatprep.subr.bf16.mxu0 %v1126_v63 }
 0x19e   :  { %418 = vmatprep.mubr.bf16.mxu1 %v181_v14 }
 0x19f   :  { %419 = vmatmul.mubr.bf16.vlgmr.msra.gmra.mrb[0].mxu1 %v180_v15 }
 0x1a0   :  { %712 = vmatpush1.bf16.msra.mxu0 %v1124_v0  ;;  %1002 = vmatpush3.bf16.msra.mxu1 %v1128_v2 }
 0x1a1   :  { %1003 = vmatprep.subr.bf16.mxu1 %v1129_v3 }
 0x1a4   :  { %1004 = vmatpush3.bf16.msra.mxu1 %v1130_v4 }
 0x1a5   :  { %1005 = vmatprep.subr.bf16.mxu1 %v1131_v5 }
 0x1a8   :  { %1006 = vmatpush3.bf16.msra.mxu1 %v1132_v6 }
 0x1a9   :  { %1007 = vmatprep.subr.bf16.mxu1 %v1133_v7 }
 0x1ac   :  { %1008 = vmatpush3.bf16.msra.mxu1 %v1134_v8 }
 0x1ad   :  { %1009 = vmatprep.subr.bf16.mxu1 %v1135_v9 }
 0x1b0   :  { %1010 = vmatpush3.bf16.msra.mxu1 %v1136_v10 }
 0x1b1   :  { %1011 = vmatprep.subr.bf16.mxu1 %v1137_v11 }
 0x1b4   :  { %1012 = vmatpush3.bf16.msra.mxu1 %v1138_v12 }
 0x272   :  { %v420_v39 = vpop.f32.mrb[0].mxu1 }
 0x273   :  { %v421_v40 = vadd.f32 %v420_v39, %v219_v37  ;;  %v422_v41 = vpop.f32.mrb[1].mxu1  ;;  %v1139_v39 = vld [vmem:[%s1512_s11 + $0x70] sm:$0xff]  }
 0x274   :  { %v423_v42 = vadd.f32 %v422_v41, %v223_v38  ;;  %v424_v43 = vpop.f32.mrb[2].mxu1  ;;  %1013 = vmatprep.subr.bf16.mxu1 %v1139_v39  ;;  %v1141_v41 = vld [vmem:[%s1512_s11 + $0x78] sm:$0xff]  }
 0x275   :  { %v1411_v44 = vmax.f32 %v421_v40, 0.0  ;;  %v425_v45 = vpop.f32.mrb[3].mxu1  ;;  %v1140_v40 = vld [vmem:[%s1512_s11 + $0x30] sm:$0xff]   ;;  %v509_v43 = vld [vmem:[%s1511_s10] sm:$0x3]  ;;  %s1199_s10 = smov [#allocation5]  }
 0x276   :  { %v1413_v46 = vmax.f32 %v423_v42, 0.0  ;;  %1014 = vmatpush3.bf16.msra.mxu1 %v1140_v40  ;;  %v1142_v42 = vld [vmem:[%s1512_s11 + $0x38] sm:$0xff]   ;;  %v518_v45 = vrot.slane %v509_v43, %v1350_v27  ;;  %s908_s2 = sshll.u32 %s1199_s10, 4  ;;  %s909_s2 = int_to_ptr.vmem [resolvable:$true] %s908_s2 }
 0x277   :  { %v435_v48 = vmul.f32 %v1411_v44, %v1411_v44  ;;  %1015 = vmatprep.subr.bf16.mxu1 %v1141_v41  ;;  %s1169_s27 = scalar_lea.vmem %s909_s2, 128  ;;  %p1174_p9 = scmp.lt.s32.totalorder %s909_s2, %s909_s2 }
 0x278   :  { %v431_v47 = vadd.f32 %v1413_v46, %v1411_v44  ;;  %v436_v49 = vmul.f32 %v1413_v46, %v1413_v46  ;;  %p1170_p8 = scmp.ne.s32.totalorder %s909_s2, %s1169_s27  ;;  %p1175_p10 = scmp.lt.s32.totalorder %s1169_s27, %s1169_s27 }
 0x27a   :  { %432 = vadd.xlane.f32.xlu1 %v431_v47  ;;  %v437_v50 = vadd.f32 %v436_v49, %v435_v48  ;;  %1016 = vmatpush3.bf16.msra.mxu1 %v1142_v42  ;;  %p1176_p11 = por %p1175_p10, %p1174_p9 }
 0x27c   :  { %p1177_p12 = pnand %p1176_p11, %p1170_p8 }
 0x27e   :  { %438 = vadd.xlane.f32.xlu1 %v437_v50 }
 0x307   :  { %v433_v13 = vpop.xlane.xlu1 %432 }
 0x308   :  { %v434_v14 = vmul.f32 0.00390625, %v433_v13 }
 0x30a   :  { %v441_v16 = vmul.f32 %v434_v14, %v434_v14  ;;  %v458_v29 = vsub.f32 %v1411_v44, %v434_v14  ;;  %v459_v30 = vsub.f32 %v1413_v46, %v434_v14  ;;  %v514_v44 = vrot.slane %v509_v43, %v1345_v25 }
 0x30b   :  { %v439_v15 = vpop.xlane.xlu1 %438 }
 0x30c   :  { %v440_v17 = vmul.f32 0.00390625, %v439_v15 }
 0x30e   :  { %v442_v18 = vsub.f32 %v440_v17, %v441_v16 }
 0x310   :  { %v443_v19 = vadd.f32 1e-05, %v442_v18 }
 0x312   :  { %1145 = vrsqrt.f32 %v443_v19 }
 0x31c   :  { %v1146_v24 = vpop.eup %1145 }
 0x31d   :  { %v457_v31 = vmul.f32 %v1146_v24, %v453_v23  ;;  %v456_v32 = vmul.f32 %v1146_v24, %v449_v22 }
 0x31f   :  { %v461_v33 = vmul.f32 %v459_v30, %v457_v31  ;;  %v460_v34 = vmul.f32 %v458_v29, %v456_v32 }
 0x321   :  { %v474_v35 = vadd.f32 %v470_v28, %v461_v33  ;;  %v473_v36 = vadd.f32 %v466_v26, %v460_v34 }
 0x323   :  { %v476_v37 = vpack.c.bf16 %v474_v35, %v474_v35  ;;  %v475_v38 = vpack.c.bf16 %v473_v36, %v473_v36 }
 0x325   :  { %713 = vmatprep.mubr.bf16.mxu0 %v476_v37 }
 0x326   :  { %714 = vmatmul.mubr.bf16.vlgmr.msra.gmra.mrb[4].mxu0 %v475_v38 }
 0x3f9   :  { %v715_v46 = vpop.f32.mrb[4].mxu0 }
 0x3fa   :  { %v716_v47 = vadd.f32 %v715_v46, %v514_v44  ;;  %v717_v48 = vpop.f32.mrb[5].mxu0 }
 0x3fb   :  { %v718_v49 = vadd.f32 %v717_v48, %v518_v45  ;;  %v719_v50 = vpop.f32.mrb[6].mxu0 }
 0x3fc   :  { %v722_v51 = vmax.f32 %v716_v47, 0.0  ;;  %v720_v52 = vpop.f32.mrb[7].mxu0 }
 0x3fd   :  { %v723_v53 = vmax.f32 %v718_v49, 0.0 }
 0x3fe   :  { %v724_v55 = vpack.c.bf16 %v722_v51, %v722_v51 }
 0x3ff   :  { %v725_v54 = vpack.c.bf16 %v723_v53, %v723_v53 }
 0x401   :  { %893 = vmatprep.mubr.bf16.mxu1 %v725_v54 }
 0x402   :  { %894 = vmatmul.mubr.bf16.vlgmr.msra.gmra.mrb[4].mxu1 %v724_v55 }
 0x4d5   :  { %v1017_v56 = vpop.f32.mrb[4].mxu1 }
 0x4d6   :  { %v1018_v25 = vpop.f32.mrb[5].mxu1 }
 0x4d7   :  { %v1019_v27 = vadd.f32 %v1018_v25, %v1017_v56  ;;  %v1020_v58 = vpop.f32.mrb[6].mxu1 }
 0x4d8   :  { %v1021_v59 = vpop.f32.mrb[7].mxu1 }
 0x4d9   :  { %v896_v60 = vadd.f32 %v1019_v27, %v984_v57 }
 0x4db   :  { %901 = vst [vmem:[#allocation5] sm:$0xff] %v896_v60 }
 0x4dc   :  { %1180 = shalt.err (!%p1177_p12)
}
 0x4dd   :  { %s1181_s12 = scalar_lea.hbm %s1514_s13, 128 }
 0x4de   :  { %p1182_p13 = scmp.ne.s32.totalorder %s1514_s13, %s1181_s12  ;;  %p1185_p0 = scmp.lt.u32.totalorder %s1181_s12, %s1514_s13 }
 0x4e0   :  { %p1187_p1 = pnand %p1185_p0, %p1182_p13 }
 0x4e2   :  { %1190 = shalt.err (!%p1187_p1)
}
 0x4e3   :  { %911 = dma.vmem_to_hbm [thread:$0]  %s909_s2, 128, %s1514_s13, [#allocation4]  }
 0x4e4   :  { %1193 = dma.done.wait [#allocation4], 128  }
 0x4e5   :  { %1194 = vsyncadd [#allocation4], 4294967168 }
 0x4e6   :  { %915 = vsyncpa [#allocation3], 1 }
 0x4e7   :  { %916 = vsyncpa [#allocation4], 1 }

</bundles_post_ra>
